<compile_context>
chip_gen: v6e
topology: v6e:2x2x1
jax: 0.10.0
libtpu: 0.0.40
codegen_flags: <defaults>
</compile_context>

<pallas_src>
import functools

import jax
import jax.numpy as jnp
from jax.experimental import pallas as pl
from jax.experimental.pallas import tpu as pltpu


def _round_up(x, m):
    return ((x + m - 1) // m) * m


def _som_dist_kernel(x_ref, xn_ref, wt_ref, wn_ref, o_ref):
    # x_ref:  (tile_b, D)       batch tile (resident across the inner neuron axis)
    # xn_ref: (tile_b, 1)       ||x||^2 per batch row
    # wt_ref: (D, tile_n)       weight tile, neuron axis on lanes (MXU RHS)
    # wn_ref: (1, tile_n)       ||w||^2 per neuron in this tile
    # o_ref:  (tile_b, tile_n)  output distance tile (lane-dense)
    xw = jnp.dot(x_ref[...], wt_ref[...], preferred_element_type=jnp.float32)
    dist = xn_ref[...] + wn_ref[...] - 2.0 * xw
    # Guard against tiny negatives from cancellation when x ~ a codebook row
    # (the true squared distance is >= 0).
    o_ref[...] = jnp.maximum(dist, 0.0)


def _auto_tiles(n128, d, b8, budget_bytes=12 << 20):
    """Pick (tile_b, tile_n), both aligned, sized against a conservative VMEM
    budget (fits v7x's 64 MiB physical VMEM with double-buffering)."""
    # Batch tile: keep the whole (small) batch resident, but cap it so huge
    # batches still fit; multiples of 8 sublanes.
    tile_b = min(b8, 512)
    # Per-neuron-column (lane) double-buffered bytes:
    #   weight col (D) + output col (tile_b) + weight-norm (1), all f32, x2 bufs.
    per_col = 2 * (d + tile_b + 1) * 4
    max_cols = max(128, (budget_bytes // per_col) // 128 * 128)
    tile_n = min(4096, n128, max_cols)
    # Keep >= 2 neuron tiles when possible so the grid has work to pipeline.
    if n128 >= 256 and n128 // tile_n < 2:
        tile_n = max(128, ((n128 // 2) // 128) * 128)
    return int(tile_b), int(tile_n)


@functools.partial(jax.jit, static_argnames=("tile_b", "tile_n"))
def toroidal_som_forward(x, weights, *, tile_b=None, tile_n=None):
    """Pallas implementation of ToroidalSOM.forward.

    x:       (B, D) float32
    weights: (rows, cols, D) float32
    returns: (B, rows, cols) float32 squared Euclidean distances
    """
    x = x.astype(jnp.float32)
    weights = weights.astype(jnp.float32)

    B, D = x.shape
    rows, cols, Dw = weights.shape
    assert D == Dw
    N = rows * cols

    # --- static padding / tile selection ------------------------------------
    B8 = _round_up(B, 8)                       # sublane alignment
    N128 = _round_up(N, 128)                   # lane alignment
    auto_tb, auto_tn = _auto_tiles(N128, D, B8)
    tb = auto_tb if tile_b is None else max(8, _round_up(min(int(tile_b), B8), 8))
    tn = auto_tn if tile_n is None else max(128, _round_up(min(int(tile_n), N128), 128))

    Bp = _round_up(B, tb)
    N_pad = _round_up(N, tn)
    grid = (Bp // tb, N_pad // tn)             # neuron axis innermost -> x tile stays resident

    # --- XLA-side prep: flatten, pad, transpose, norms (one cheap pass) -----
    w_flat = weights.reshape(N, D)
    if N_pad != N:
        w_flat = jnp.pad(w_flat, ((0, N_pad - N), (0, 0)))
    w_t = w_flat.T                                          # (D, N_pad) lane-dense neuron axis
    w_norm = jnp.sum(w_flat * w_flat, axis=1)[None, :]      # (1, N_pad)

    x_p = x if Bp == B else jnp.pad(x, ((0, Bp - B), (0, 0)))
    x_norm = jnp.sum(x_p * x_p, axis=1, keepdims=True)      # (Bp, 1)

    # --- VMEM budget (double-buffered tiles), with headroom ------------------
    vmem_bytes = (
        2 * (D * tn * 4)          # weight tile
        + 2 * (tn * 4)            # weight-norm tile
        + 2 * (tb * tn * 4)       # output tile
        + 2 * (tb * D * 4)        # batch tile
        + 2 * (tb * 4)            # batch norms
    )
    vmem_limit = int(min(max(2 * vmem_bytes, 16 << 20), 32 << 20))

    dist_flat = pl.pallas_call(
        _som_dist_kernel,
        out_shape=jax.ShapeDtypeStruct((Bp, N_pad), jnp.float32),
        grid_spec=pltpu.PrefetchScalarGridSpec(
            num_scalar_prefetch=0,
            grid=grid,
            in_specs=[
                # Batch tile + its norms: constant across the inner neuron axis.
                pl.BlockSpec((tb, D), lambda i, j: (i, 0)),
                pl.BlockSpec((tb, 1), lambda i, j: (i, 0)),
                # Weights tiled along the flattened (lane) neuron axis.
                pl.BlockSpec((D, tn), lambda i, j: (0, j)),
                pl.BlockSpec((1, tn), lambda i, j: (0, j)),
            ],
            out_specs=pl.BlockSpec((tb, tn), lambda i, j: (i, j)),
        ),
        compiler_params=pltpu.CompilerParams(
            dimension_semantics=("parallel", "parallel"),
            vmem_limit_bytes=vmem_limit,
        ),
    )(x_p, x_norm, w_t, w_norm)

    return dist_flat[:B, :N].reshape(B, rows, cols)


if __name__ == "__main__":
    # Small deterministic setup consistent with ToroidalSOM.__init__:
    #   grid_size = (16, 16), input_dim = 32, batch = 8
    rows, cols = 16, 16
    input_dim = 32
    batch = 8

    key = jax.random.PRNGKey(0)
    k_w, k_x = jax.random.split(key)

    # Random weight init (the non-PCA branch of _initialize_weights).
    weights = jax.random.normal(k_w, (rows, cols, input_dim), dtype=jnp.float32)
    x = jax.random.normal(k_x, (batch, input_dim), dtype=jnp.float32)

    dists = toroidal_som_forward(x, weights)
    dists = jax.block_until_ready(dists)

    # Reference: the PyTorch forward, in plain JAX.
    ref = jnp.sum((weights[None, :, :, :] - x[:, None, None, :]) ** 2, axis=3)
    assert dists.shape == (batch, rows, cols)
    if not jnp.allclose(dists, ref, rtol=1e-4, atol=1e-4):
        max_err = jnp.max(jnp.abs(dists - ref))
        raise AssertionError(
            f"Pallas SOM distances do not match reference (max abs err {max_err})"
        )

    print("KERNEL_OK")
</pallas_src>

<mosaic_0001>
module attributes {stable_mosaic.version = 11 : i64} {
  func.func @_som_dist_kernel(%arg0: i32, %arg1: i32, %arg2: memref<8x32xf32, #tpu.memory_space<vmem>>, %arg3: memref<8x1xf32, #tpu.memory_space<vmem>>, %arg4: memref<32x128xf32, #tpu.memory_space<vmem>>, %arg5: memref<1x128xf32, #tpu.memory_space<vmem>>, %arg6: memref<8x128xf32, #tpu.memory_space<vmem>>) attributes {dimension_semantics = [#tpu.dimension_semantics<parallel>, #tpu.dimension_semantics<parallel>], iteration_bounds = array<i64: 1, 2>, scalar_prefetch = 0 : i64, scratch_operands = 0 : i64, tpu.core_type = #tpu.core_type<tc>, window_params = [{transform_indices = @transform_0, window_bounds = array<i64: 8, 32>}, {transform_indices = @transform_1, window_bounds = array<i64: 8, 1>}, {transform_indices = @transform_2, window_bounds = array<i64: 32, 128>}, {transform_indices = @transform_3, window_bounds = array<i64: 1, 128>}, {transform_indices = @transform_4, window_bounds = array<i64: 8, 128>}]} {
    %c0 = arith.constant 0 : index
    %c0_0 = arith.constant 0 : index
    %0 = vector.load %arg2[%c0, %c0_0] : memref<8x32xf32, #tpu.memory_space<vmem>>, vector<8x32xf32>
    %c0_1 = arith.constant 0 : index
    %c0_2 = arith.constant 0 : index
    %1 = vector.load %arg4[%c0_1, %c0_2] : memref<32x128xf32, #tpu.memory_space<vmem>>, vector<32x128xf32>
    %cst = arith.constant dense<0.000000e+00> : vector<8x128xf32>
    %2 = tpu.matmul %0, %1, %cst {dimension_numbers = #tpu.dot_dimension_numbers<[1], [0], [0], [1], [0, 0, 1, 1], [], []>} : vector<8x32xf32>, vector<32x128xf32>, vector<8x128xf32> -> vector<8x128xf32>
    %c0_3 = arith.constant 0 : index
    %c0_4 = arith.constant 0 : index
    %3 = vector.load %arg3[%c0_3, %c0_4] : memref<8x1xf32, #tpu.memory_space<vmem>>, vector<8x1xf32>
    %c0_5 = arith.constant 0 : index
    %c0_6 = arith.constant 0 : index
    %4 = vector.load %arg5[%c0_5, %c0_6] : memref<1x128xf32, #tpu.memory_space<vmem>>, vector<1x128xf32>
    %5 = vector.broadcast %3 : vector<8x1xf32> to vector<8x128xf32>
    %6 = vector.broadcast %4 : vector<1x128xf32> to vector<8x128xf32>
    %7 = arith.addf %5, %6 : vector<8x128xf32>
    %cst_7 = arith.constant 2.000000e+00 : f32
    %8 = vector.broadcast %cst_7 : f32 to vector<8x128xf32>
    %9 = arith.mulf %8, %2 : vector<8x128xf32>
    %10 = arith.subf %7, %9 : vector<8x128xf32>
    %cst_8 = arith.constant 0.000000e+00 : f32
    %11 = vector.broadcast %cst_8 : f32 to vector<8x128xf32>
    %12 = arith.maximumf %10, %11 : vector<8x128xf32>
    %c0_9 = arith.constant 0 : index
    %c0_10 = arith.constant 0 : index
    %13 = vector.load %arg6[%c0_9, %c0_10] : memref<8x128xf32, #tpu.memory_space<vmem>>, vector<8x128xf32>
    tpu.vector_store %arg6[%c0_9, %c0_10], %12 {strides = array<i32>} : memref<8x128xf32, #tpu.memory_space<vmem>>, vector<8x128xf32>,
    return
  }
  func.func @transform_0(%arg0: i32, %arg1: i32) -> (i32, i32) {
    %c0_i32 = arith.constant 0 : i32
    %c0_i32_0 = arith.constant 0 : i32
    return %arg0, %c0_i32 : i32, i32
  }
  func.func @transform_1(%arg0: i32, %arg1: i32) -> (i32, i32) {
    %c0_i32 = arith.constant 0 : i32
    %c0_i32_0 = arith.constant 0 : i32
    return %arg0, %c0_i32 : i32, i32
  }
  func.func @transform_2(%arg0: i32, %arg1: i32) -> (i32, i32) {
    %c0_i32 = arith.constant 0 : i32
    %c0_i32_0 = arith.constant 0 : i32
    return %c0_i32, %arg1 : i32, i32
  }
  func.func @transform_3(%arg0: i32, %arg1: i32) -> (i32, i32) {
    %c0_i32 = arith.constant 0 : i32
    %c0_i32_0 = arith.constant 0 : i32
    return %c0_i32, %arg1 : i32, i32
  }
  func.func @transform_4(%arg0: i32, %arg1: i32) -> (i32, i32) {
    %c0_i32 = arith.constant 0 : i32
    return %arg0, %arg1 : i32, i32
  }
}

</mosaic_0001>

<bundles_post_ra>
// kernel: toroidal_som_forward.1
= control target key start
LH: loop header
LB: loop body
LE: loop exit
PB: predicated region body
PF: predicated region fallthrough
CT: control target
= control target key end

     0   :  { %s676_s15 = smov 0   ;;  %s678_s16 = smov 0   ;;  %s751_s0 = inlined_call_operand.vmem [shape: f32[8,32], index: 0, kind: input, shape index: {}]   ;;  %s752_s1 = inlined_call_operand.vmem [shape: f32[8,1], index: 1, kind: input, shape index: {}]   ;;  %s753_s2 = inlined_call_operand.vmem [shape: f32[32,256], index: 2, kind: input, shape index: {}]   ;;  %s754_s3 = inlined_call_operand.vmem [shape: f32[1,256], index: 3, kind: input, shape index: {}]   ;;  %s755_s4 = inlined_call_operand.vmem [shape: f32[8,256], index: 4, kind: output, shape index: {}]  }
   0x1   :  { %s680_s17 = smov 0   ;;  %s682_s18 = smov 0  }
   0x2   :  { %s684_s19 = smov 0  }
   0x3 LB: > { %s23_s20 = sadd.s32 1, %s642_s18  ;;  %p92_p1 = scmp.ne.s32.totalorder %s634_s16, %s630_s15  ;;  %s646_s19 = sphi %s684_s19, %s14_s19   ;;  %s642_s18 = sphi %s682_s18, %s759_s18   ;;  %s638_s17 = sphi %s680_s17, %s758_s17   ;;  %s634_s16 = sphi %s678_s16, %s757_s16   ;;  %s630_s15 = sphi %s676_s15, %s756_s15  }
   0x4   : > { %p24_p0 = scmp.ge.s32.totalorder %s23_s20, 2  ;;  %p93_p2 = scmp.eq.s32.totalorder %s646_s19, 0 }
   0x5   : > { %s85_s22 = sadd.s32 1, %s634_s16  ;;  %p538_p5 = scmp.ge.s32.totalorder %s646_s19, 2 }
   0x6   : > { %s761_s20 = smov (%p24_p0, %s23_s20), 0  ;;  %p94_p3 = por %p93_p2, %p92_p1 }
   0x7   : > { %s82_s21 = ssub.s32 %s642_s18, %s761_s20  ;;  %186 = sbr.rel (%p538_p5) target bundleno = 18 (0x12), region = 24 }
   0x8   : > { %p83_p4 = scmp.eq.s32.totalorder %s82_s21, 0 }
   0xa   : > { %s711_s23 = scalar_select %p83_p4, %s634_s16, %s85_s22  }
   0xc   : > { %189 = sbr.rel (!%p94_p3) target bundleno = 18 (0x12), region = 28  ;;  %s191_s24 = sand.u32 (%p94_p3), 1, %s634_s16  }
   0xd   : > { %s540_s25 = sshll.u32 (%p94_p3), %s642_s18, 3  ;;  %s539_s26 = sshll.u32 (%p94_p3), %s191_s24, 5 }
   0xe   : > { %s195_s29 = scalar_lea.vmem (%p94_p3), %s753_s2, %s540_s25  ;;  %s193_s30 = scalar_lea.vmem (%p94_p3), [#allocation2], %s539_s26 }
   0xf   : > { %v230_v0 = vld [vmem:[%s195_s29] sm:$0xff] (%p94_p3)  ;;  %v232_v1 = vld [vmem:[%s195_s29 + $0x10] sm:$0xff] (%p94_p3) }
  0x10   : > { %v234_v2 = vld [vmem:[%s195_s29 + $0x20] sm:$0xff] (%p94_p3)  ;;  %231 = vst [vmem:[%s193_s30] sm:$0xff] (%p94_p3), %v230_v0  ;;  %233 = vst [vmem:[%s193_s30 + $0x8] sm:$0xff] (%p94_p3), %v232_v1  ;;  %v236_v3 = vld [vmem:[%s195_s29 + $0x30] sm:$0xff] (%p94_p3) }
  0x11   : > { %235 = vst [vmem:[%s193_s30 + $0x10] sm:$0xff] %v234_v2  ;;  %237 = vst [vmem:[%s193_s30 + $0x18] sm:$0xff] %v236_v3 }
  0x12 PF: > { %p541_p6 = scmp.ge.s32.totalorder %s646_s19, 1  ;;  %p248_p7 = scmp.lt.s32.totalorder %s646_s19, 3 }
  0x14   : > { %p249_p8 = pnand %p541_p6, %p248_p7 }
  0x15   : > { %s255_s5 = sand.u32 (!%p249_p8), 1, %s630_s15   ;;  %p302_p9 = scmp.lt.s32.totalorder (!%p249_p8), %s638_s17, 1 }
  0x16   : > { %252 = sbr.rel (%p249_p8) target bundleno = 236 (0xec), region = 70  ;;  %s542_s6 = sshll.u32 (!%p249_p8), %s255_s5, 5 }
  0x17   : > { %s257_s9 = scalar_lea.vmem (!%p249_p8), [#allocation2], %s542_s6 }
  0x1b   : > { %v648_v4 = vmov 0.0   ;;  %vm649_vm0 = vmmov 0   ;;  %v392_v5 = vld [vmem:[%s752_s1] sm:$0xff]  ;;  %v650_v6 = vmov 0   ;;  %v317_v7 = vld [vmem:[%s257_s9 + $0x18] sm:$0xff]  ;;  %v316_v8 = vld [vmem:[%s257_s9 + $0x10] sm:$0xff] }
  0x1c   : > { %553 = vmatprep.subr.mxu0 %v648_v4  ;;  %561 = vmatprep.mubr.msk.f32.mxu0 %vm649_vm0, %v648_v4  ;;  %v315_v9 = vld [vmem:[%s257_s9 + $0x8] sm:$0xff]  ;;  %v314_v10 = vld [vmem:[%s257_s9] sm:$0xff]  ;;  %vm318_vm1 = vcmask 261120   ;;  %s763_s17 = smov (!%p302_p9, %s638_s17), 1 }
  0x1d   : > { %607 = vset.pattern.permute.xlu0 %v650_v6  ;;  %554 = vmatpush3.msra.mxu0 %v317_v7  ;;  %v313_v11 = vld [vmem:[%s751_s0] sm:$0xff]  ;;  %s304_s14 = scalar_lea.vmem %s754_s3, %s763_s17  ;;  %s543_s15 = sshll.u32 %s763_s17, 3 }
  0x1e   : > { %396 = vperm.xlu0 %607, %v392_v5   ;;  %555 = vmatprep.subr.mxu0 %v648_v4  ;;  %v545_v13 = vld [vmem:[%s304_s14] ss:$0 sm:$0xff]  ;;  %s312_s24 = scalar_lea.vmem %s755_s4, %s543_s15 }
  0x1f   : > { %556 = vmatpush3.msra.mxu0 %v316_v8 }
  0x20   : > { %557 = vmatprep.subr.mxu0 %v648_v4 }
  0x21   : > { %558 = vmatpush3.msra.mxu0 %v315_v9 }
  0x22   : > { %559 = vmatprep.subr.mxu0 %v648_v4 }
  0x23   : > { %560 = vmatpush3.msra.mxu0 %v314_v10 }
  0x24   : > { %562 = vmatmul.mubr.msk.f32.vlgmr.msra.gmra.mxu0 %vm318_vm1, %v313_v11 }
  0x99   : > { %v397_v12 = vpop.permute.xlu0 %396 }
  0x9a   : > { %v405_v14 = vadd.f32 %v545_v13, %v397_v12 }
  0xe4   : > { %v388_v15 = vpop.f32.mrf.mxu0 }
  0xe5   : > { %v406_v16 = vmul.f32 2.0, %v388_v15 }
  0xe6   : > { %v563_v17 = vpop.f32.mrf.mxu0 }
  0xe7   : > { %v407_v18 = vsub.f32 %v405_v14, %v406_v16 }
  0xe9   : > { %v408_v19 = vmax.f32 %v407_v18, 0.0 }
  0xeb   : > { %409 = vst [vmem:[%s312_s24] sm:$0xff] %v408_v19 }
  0xec PF: > { %s14_s19 = sadd.s32 1, %s646_s19   ;;  %s756_s15 = smov %s634_s16 }
  0xed   : > { %p11_p10 = scmp.ge.s32.totalorder %s14_s19, 4   ;;  %s757_s16 = smov %s711_s23 }
  0xee   : > { %s758_s17 = smov %s642_s18  ;;  %s759_s18 = smov %s761_s20 }
  0xef   :  { %13 = sbr.rel (!%p11_p10) target bundleno = 3 (0x3), region = 118 }

</bundles_post_ra>
